<compile_context>
chip_gen: v7x
topology: tpu7x:2x2x1
jax: 0.10.0
libtpu: 0.0.40
codegen_flags: <defaults>
</compile_context>

<pallas_src>
import math

import jax
import jax.numpy as jnp
from jax.experimental import pallas as pl
from jax.experimental.pallas import tpu as pltpu


def _linreg_kernel(w_ref, b_ref, x_ref, o_ref):
    # w_ref / b_ref are (1, 1) float32 scalars in SMEM; x_ref / o_ref are VMEM
    # tiles.  Cast the scalars in-kernel (one free scalar op per grid step) so
    # the VPU math runs in the input dtype.
    w = w_ref[0, 0].astype(x_ref.dtype)
    b = b_ref[0, 0].astype(x_ref.dtype)
    o_ref[...] = (x_ref[...] * w + b).astype(o_ref.dtype)


def _round_up(v: int, m: int) -> int:
    return (v + m - 1) // m * m


def _device_kind() -> str:
    try:
        return jax.devices()[0].device_kind.lower()
    except Exception:
        return ""


def _choose_view(x, total):
    """Pick a (rows, lane) 2-D view of x, avoiding pads whenever possible."""
    shape = x.shape
    # Common activation case: trailing dim already lane-aligned -> pure reshape.
    if len(shape) >= 2 and shape[-1] % 128 == 0 and shape[-1] <= 16384:
        lane = shape[-1]
        return x.reshape(total // lane, lane), lane, False
    # Otherwise find the widest lane width that divides numel(x) exactly.
    for lane in (2048, 1024, 512, 256, 128):
        if total % lane == 0:
            return jnp.ravel(x).reshape(total // lane, lane), lane, False
    # Truly ragged: minimal pad to the next multiple of 128 (one extra HBM
    # pass; only hit by sizes that are not a multiple of 128).
    lane = 128
    rows = pl.cdiv(total, lane)
    x_flat = jnp.pad(jnp.ravel(x), (0, rows * lane - total))
    return x_flat.reshape(rows, lane), lane, True


def _choose_tile_rows(rows, lane, itemsize, sublane, kind):
    target_bytes = (4 << 20) if "v7" in kind else (2 << 20)
    tile_rows = max(sublane, target_bytes // (lane * itemsize))
    tile_rows = _round_up(tile_rows, sublane)
    if "v7" in kind:
        # v7x has two TensorCores per chip: ensure the grid has >= 2 steps
        # (when the input is big enough) so "parallel" can shard the work.
        half = _round_up(pl.cdiv(rows, 2), sublane)
        tile_rows = min(tile_rows, max(half, sublane))
    if rows < sublane:
        return rows                       # block equals the full (tiny) array
    return min(tile_rows, _round_up(rows, sublane))


def linear_regression_forward(x: jax.Array, weight: jax.Array,
                              bias: jax.Array) -> jax.Array:
    """Elementwise y = weight * x + bias with scalar weight/bias (shape (1,))."""
    orig_shape = x.shape
    dtype = x.dtype
    total = math.prod(orig_shape) if orig_shape else 1
    if total == 0:                        # empty input: nothing to compute
        return jnp.zeros(orig_shape, dtype)

    # Keep the scalars float32 in SMEM (32-bit scalar path); cast in-kernel.
    w2 = weight.reshape(1, 1).astype(jnp.float32)
    b2 = bias.reshape(1, 1).astype(jnp.float32)

    x2, lane, padded = _choose_view(x, total)
    rows = x2.shape[0]

    itemsize = jnp.dtype(dtype).itemsize
    sublane = max(8, 32 // itemsize)      # 8 (f32) / 16 (bf16) / 32 (i8, fp8)
    kind = _device_kind()
    tile_rows = _choose_tile_rows(rows, lane, itemsize, sublane, kind)
    grid = (pl.cdiv(rows, tile_rows),)    # partial last block masked by Pallas

    y2 = pl.pallas_call(
        _linreg_kernel,
        out_shape=jax.ShapeDtypeStruct((rows, lane), dtype),
        grid_spec=pl.GridSpec(
            grid=grid,
            in_specs=[
                pl.BlockSpec(memory_space=pltpu.MemorySpace.SMEM),  # weight
                pl.BlockSpec(memory_space=pltpu.MemorySpace.SMEM),  # bias
                pl.BlockSpec((tile_rows, lane), lambda i: (i, 0)),
            ],
            out_specs=pl.BlockSpec((tile_rows, lane), lambda i: (i, 0)),
        ),
        compiler_params=pltpu.CompilerParams(
            # Independent tiles -> shard grid across TensorCores (v7x megacore).
            dimension_semantics=("parallel",)),
    )(w2, b2, x2)

    if padded:
        return y2.reshape(-1)[:total].reshape(orig_shape)
    return y2.reshape(orig_shape)


if __name__ == "__main__":
    key = jax.random.PRNGKey(0)
    k_w, k_b, k_x1, k_x2, k_x3 = jax.random.split(key, 5)

    # Deterministic "randn"-style parameter init, shapes (1,) as in the module.
    weight = jax.random.normal(k_w, (1,), dtype=jnp.float32)
    bias = jax.random.normal(k_b, (1,), dtype=jnp.float32)

    def ref(x):
        return weight[0] * x + bias[0]

    # Main input: last dim not lane-aligned -> flat widest-divisor path (no pad).
    x1 = jax.random.normal(k_x1, (2, 4, 16, 16), dtype=jnp.float32)
    y1 = jax.block_until_ready(linear_regression_forward(x1, weight, bias))
    assert y1.shape == x1.shape and jnp.allclose(y1, ref(x1), atol=1e-6), "mismatch (4-D)"

    # Lane-aligned activation shape: pure-reshape path (no pad, no ravel copy).
    x2 = jax.random.normal(k_x2, (16, 128), dtype=jnp.float32)
    y2 = jax.block_until_ready(linear_regression_forward(x2, weight, bias))
    assert jnp.allclose(y2, ref(x2), atol=1e-6), "mismatch (aligned)"

    # Truly ragged shape: exercises the minimal pad + slice-back fallback.
    x3 = jax.random.normal(k_x3, (7, 33), dtype=jnp.float32)
    y3 = jax.block_until_ready(linear_regression_forward(x3, weight, bias))
    assert jnp.allclose(y3, ref(x3), atol=1e-6), "mismatch (ragged)"

    print("KERNEL_OK")
</pallas_src>

<mosaic_0001>
module attributes {stable_mosaic.version = 11 : i64} {
  func.func @_linreg_kernel(%arg0: i32, %arg1: memref<1x1xf32, #tpu.memory_space<smem>>, %arg2: memref<1x1xf32, #tpu.memory_space<smem>>, %arg3: memref<1x2048xf32, #tpu.memory_space<vmem>>, %arg4: memref<1x2048xf32, #tpu.memory_space<vmem>>) attributes {dimension_semantics = [#tpu.dimension_semantics<parallel>], iteration_bounds = array<i64: 1>, scalar_prefetch = 0 : i64, scratch_operands = 0 : i64, tpu.core_type = #tpu.core_type<tc>, window_params = [{transform_indices = @transform_0, window_bounds = array<i64: 1, 1>}, {transform_indices = @transform_1, window_bounds = array<i64: 1, 1>}, {transform_indices = @transform_2, window_bounds = array<i64: 1, 2048>}, {transform_indices = @transform_3, window_bounds = array<i64: 1, 2048>}]} {
    %c0 = arith.constant 0 : index
    %c0_0 = arith.constant 0 : index
    %0 = memref.load %arg1[%c0, %c0_0] : memref<1x1xf32, #tpu.memory_space<smem>>
    %c0_1 = arith.constant 0 : index
    %c0_2 = arith.constant 0 : index
    %1 = memref.load %arg2[%c0_1, %c0_2] : memref<1x1xf32, #tpu.memory_space<smem>>
    %c0_3 = arith.constant 0 : index
    %c0_4 = arith.constant 0 : index
    %2 = vector.load %arg3[%c0_3, %c0_4] : memref<1x2048xf32, #tpu.memory_space<vmem>>, vector<1x2048xf32>
    %3 = vector.broadcast %0 : f32 to vector<1x2048xf32>
    %4 = arith.mulf %2, %3 : vector<1x2048xf32>
    %5 = vector.broadcast %1 : f32 to vector<1x2048xf32>
    %6 = arith.addf %4, %5 : vector<1x2048xf32>
    %c0_5 = arith.constant 0 : index
    %c0_6 = arith.constant 0 : index
    %7 = vector.load %arg4[%c0_5, %c0_6] : memref<1x2048xf32, #tpu.memory_space<vmem>>, vector<1x2048xf32>
    tpu.vector_store %arg4[%c0_5, %c0_6], %6 {strides = array<i32>} : memref<1x2048xf32, #tpu.memory_space<vmem>>, vector<1x2048xf32>,
    return
  }
  func.func @transform_0(%arg0: i32) -> (i32, i32) {
    %c0_i32 = arith.constant 0 : i32
    %c0_i32_0 = arith.constant 0 : i32
    %c0_i32_1 = arith.constant 0 : i32
    return %c0_i32, %c0_i32_0 : i32, i32
  }
  func.func @transform_1(%arg0: i32) -> (i32, i32) {
    %c0_i32 = arith.constant 0 : i32
    %c0_i32_0 = arith.constant 0 : i32
    %c0_i32_1 = arith.constant 0 : i32
    return %c0_i32, %c0_i32_0 : i32, i32
  }
  func.func @transform_2(%arg0: i32) -> (i32, i32) {
    %c0_i32 = arith.constant 0 : i32
    %c0_i32_0 = arith.constant 0 : i32
    return %arg0, %c0_i32 : i32, i32
  }
  func.func @transform_3(%arg0: i32) -> (i32, i32) {
    %c0_i32 = arith.constant 0 : i32
    %c0_i32_0 = arith.constant 0 : i32
    return %arg0, %c0_i32 : i32, i32
  }
}

</mosaic_0001>

<bundles_post_ra>
// kernel: tpu_custom_call.1
= control target key start
LH: loop header
LB: loop body
LE: loop exit
PB: predicated region body
PF: predicated region fallthrough
CT: control target
= control target key end

     0   :  { %10 = vsyncpa [#allocation5], 0  ;;  %s158_s0 = inlined_call_operand.<no memory space> [shape: f32[1,1], index: 0, kind: input, shape index: {}]   ;;  %s159_s1 = inlined_call_operand.<no memory space> [shape: f32[1,1], index: 1, kind: input, shape index: {}]   ;;  %s160_s2 = inlined_call_operand.hbm [shape: f32[1,2048], index: 2, kind: input, shape index: {}]   ;;  %s161_s3 = inlined_call_operand.hbm [shape: f32[1,2048], index: 3, kind: output, shape index: {}]  }
   0x1   :  { %11 = vsyncpa [#allocation6], 0  ;;  %s106_s12 = smov [#allocation4]   ;;  %s58_s16 = scalar_lea.hbm %s160_s2, 256 }
   0x2   :  { %s22_s13 = sshll.u32 %s106_s12, 4  ;;  %p59_p0 = scmp.ne.s32.totalorder %s160_s2, %s58_s16  ;;  %s23_s13 = int_to_ptr.vmem [resolvable:$true] %s22_s13 }
   0x3   :  { %p62_p1 = scmp.lt.u32.totalorder %s58_s16, %s160_s2 }
   0x5   :  { %p64_p2 = pnand %p62_p1, %p59_p0 }
   0x7   :  { %67 = shalt.err (!%p64_p2)
}
   0x8   :  { %s68_s21 = scalar_lea.vmem %s23_s13, 256  ;;  %p73_p4 = scmp.lt.s32.totalorder %s23_s13, %s23_s13 }
   0x9   :  { %p69_p3 = scmp.ne.s32.totalorder %s23_s13, %s68_s21  ;;  %p74_p5 = scmp.lt.s32.totalorder %s68_s21, %s68_s21 }
   0xb   :  { %p75_p6 = por %p74_p5, %p73_p4 }
   0xd   :  { %p76_p7 = pnand %p75_p6, %p69_p3 }
   0xf   :  { %79 = shalt.err (!%p76_p7)
}
  0x10   :  { %25 = dma.hbm_to_vmem [thread:$0]  %s160_s2, 256, %s23_s13, [#allocation5]  }
  0x11   :  { %102 = dma.done.wait [#allocation5], 256  }
  0x12   :  { %103 = vsyncadd [#allocation5], 4294967040  ;;  %v33_v0 = vstv %s158_s0  ;;  %v31_v1 = vld [vmem:[#allocation4] sm:$0xff]  ;;  %v36_v2 = vstv %s159_s1  ;;  %v32_v3 = vld [vmem:[#allocation4 + $0x8] sm:$0xff]  ;;  %s107_s28 = smov [#allocation7]  }
  0x13   :  { %s47_s29 = sshll.u32 %s107_s28, 4  ;;  %v34_v4 = vmul.f32 %v33_v0, %v31_v1  ;;  %v35_v5 = vmul.f32 %v33_v0, %v32_v3  ;;  %s48_s29 = int_to_ptr.vmem [resolvable:$true] %s47_s29 }
  0x14   :  { %s80_s2 = scalar_lea.vmem %s48_s29, 256  ;;  %p85_p9 = scmp.lt.s32.totalorder %s48_s29, %s48_s29 }
  0x15   :  { %v37_v6 = vadd.f32 %v36_v2, %v34_v4  ;;  %v38_v7 = vadd.f32 %v36_v2, %v35_v5  ;;  %p81_p8 = scmp.ne.s32.totalorder %s48_s29, %s80_s2  ;;  %p86_p10 = scmp.lt.s32.totalorder %s80_s2, %s80_s2 }
  0x17   :  { %39 = vst [vmem:[#allocation7] sm:$0xff] %v37_v6  ;;  %40 = vst [vmem:[#allocation7 + $0x8] sm:$0xff] %v38_v7  ;;  %p87_p11 = por %p86_p10, %p85_p9 }
  0x19   :  { %p88_p12 = pnand %p87_p11, %p81_p8 }
  0x1b   :  { %91 = shalt.err (!%p88_p12)
}
  0x1c   :  { %s92_s1 = scalar_lea.hbm %s161_s3, 256 }
  0x1d   :  { %p93_p13 = scmp.ne.s32.totalorder %s161_s3, %s92_s1  ;;  %p96_p0 = scmp.lt.u32.totalorder %s92_s1, %s161_s3 }
  0x1f   :  { %p98_p1 = pnand %p96_p0, %p93_p13 }
  0x21   :  { %101 = shalt.err (!%p98_p1)
}
  0x22   :  { %50 = dma.vmem_to_hbm [thread:$0]  %s48_s29, 256, %s161_s3, [#allocation6]  }
  0x23   :  { %104 = dma.done.wait [#allocation6], 256  }
  0x24   :  { %105 = vsyncadd [#allocation6], 4294967040 }
  0x25   :  { %54 = vsyncpa [#allocation5], 1 }
  0x26   :  { %55 = vsyncpa [#allocation6], 1 }

</bundles_post_ra>
